<compile_context>
chip_gen: v7x
topology: tpu7x:2x2x1
jax: 0.10.0
libtpu: 0.0.40
codegen_flags: <defaults>
</compile_context>

<pallas_src>
import jax
import jax.numpy as jnp
from jax.experimental import pallas as pl
from jax.experimental.pallas import tpu as pltpu

_LANE = 128
_BLOCK_BYTES = 4 << 20          # per in/out block buffer (~4 MiB)
_VMEM_LIMIT_BYTES = 24 << 20    # (in+out) * 2 buffers * 4 MiB = 16 MiB + headroom
_MIN_SPLIT_ROWS = 1024          # above this, force >= 2 grid blocks (v7x dual-TC)
_MIN_PALLAS_ELEMS = 1 << 16     # below this, plain fused XLA is faster


def _round_up(a, b):
    return ((a + b - 1) // b) * b


def _make_piecewise(x1, y1, x2, y2, left_slope, right_slope, ignore_right_step):
    """Returns apply(x) implementing the BoundGeneralStep forward (where-select)."""
    # Derived affine params, exactly as in BoundGeneralStep.__init__
    left_b = y1 - left_slope * x1
    right_b = y2 - right_slope * x2
    middle_slope = (y2 - y1) / (x2 - x1)
    middle_b = y1 - middle_slope * x1

    def apply(x):
        left = left_slope * x + left_b
        middle = middle_slope * x + middle_b
        if ignore_right_step:
            return jnp.where(x < x1, left, middle)
        right = right_slope * x + right_b
        return jnp.where(x < x1, left, jnp.where(x > x2, right, middle))

    return apply


def bound_general_step_forward(x, *, x1, y1, x2, y2,
                               left_slope=0.0, right_slope=0.0,
                               ignore_right_step=False,
                               min_pallas_elems=_MIN_PALLAS_ELEMS):
    """Elementwise forward of BoundGeneralStep. Accepts any shape (e.g. NCHW).

    Floating dtypes only.  Non-finite inputs follow where-select semantics
    (see module header) rather than PyTorch's mask-multiply NaN behavior.
    """
    if not jnp.issubdtype(x.dtype, jnp.floating):
        raise TypeError(f"bound_general_step_forward expects a floating dtype, got {x.dtype}")

    apply = _make_piecewise(float(x1), float(y1), float(x2), float(y2),
                            float(left_slope), float(right_slope),
                            bool(ignore_right_step))

    orig_shape = x.shape
    total = x.size
    dtype = x.dtype
    itemsize = jnp.dtype(dtype).itemsize

    # Small-input fast path: pallas_call launch + pipeline prologue would dominate.
    if total < min_pallas_elems or total < _LANE:
        return apply(x).astype(dtype)

    xf = x.reshape(-1)
    main = (total // _LANE) * _LANE        # lane-aligned prefix handled by the kernel
    tail = total - main                    # < 128 leftover elements (JAX epilogue)

    x2d = jax.lax.slice(xf, (0,), (main,)).reshape(main // _LANE, _LANE)
    M = main // _LANE

    # Block rows: ~4 MiB per buffer (multiple of 32 rows -> covers every sublane
    # pack), but force >= 2 blocks on mid-size inputs so both v7x TensorCores
    # stream HBM instead of collapsing to grid=(1,).
    max_rows = max(32, _BLOCK_BYTES // (_LANE * itemsize))
    if M <= _MIN_SPLIT_ROWS:
        block_rows = M                      # full extent: always a legal block shape
    else:
        block_rows = min(max_rows, _round_up(pl.cdiv(M, 2), 32))
    grid = (pl.cdiv(M, block_rows),)

    def kernel(x_ref, o_ref):
        o_ref[...] = apply(x_ref[...]).astype(o_ref.dtype)

    cost = pl.CostEstimate(
        flops=5 * main,                     # 2 mul + 2 add + selects per element
        transcendentals=0,
        bytes_accessed=2 * main * itemsize,
    )

    out2d = pl.pallas_call(
        kernel,
        out_shape=jax.ShapeDtypeStruct((M, _LANE), dtype),
        grid_spec=pltpu.PrefetchScalarGridSpec(
            num_scalar_prefetch=0,
            grid=grid,
            in_specs=[pl.BlockSpec((block_rows, _LANE), lambda i: (i, 0))],
            out_specs=pl.BlockSpec((block_rows, _LANE), lambda i: (i, 0)),
        ),
        compiler_params=pltpu.CompilerParams(
            dimension_semantics=("parallel",),
            vmem_limit_bytes=_VMEM_LIMIT_BYTES,
            allow_input_fusion=[True],
        ),
        cost_estimate=cost,
    )(x2d)

    out_main = out2d.reshape(-1)
    if tail:
        # <128-element ragged tail: plain-JAX epilogue (same where-select math),
        # no whole-tensor pad copy.
        x_tail = jax.lax.slice(xf, (main,), (total,))
        out_tail = apply(x_tail).astype(dtype)
        out = jnp.concatenate([out_main, out_tail])
    else:
        out = out_main
    return out.reshape(orig_shape)


def _reference_forward(x, *, x1, y1, x2, y2, left_slope, right_slope,
                       ignore_right_step=False):
    """Pure-JAX mirror of the PyTorch forward (mask-multiply, for verification)."""
    left_b = y1 - left_slope * x1
    right_b = y2 - right_slope * x2
    middle_slope = (y2 - y1) / (x2 - x1)
    middle_b = y1 - middle_slope * x1
    dt = x.dtype
    minus = (x < x1)
    if ignore_right_step:
        plus_m = ~minus
        return ((left_slope * x + left_b) * minus.astype(dt)
                + (middle_slope * x + middle_b) * plus_m.astype(dt))
    plus = (x > x2)
    medium = ~(minus | plus)
    return ((left_slope * x + left_b) * minus.astype(dt)
            + (middle_slope * x + middle_b) * medium.astype(dt)
            + (right_slope * x + right_b) * plus.astype(dt))


if __name__ == "__main__":
    # Deterministic "module parameters" (BoundGeneralStep.__init__ args).
    params = dict(x1=-1.0, y1=0.0, x2=1.0, y2=1.0,
                  left_slope=0.1, right_slope=0.05)

    key = jax.random.PRNGKey(0)

    # Small NCHW input consistent with a conv-net activation layer.
    x = jax.random.normal(key, (2, 4, 16, 16), dtype=jnp.float32) * 2.0
    ref = _reference_forward(x, **params, ignore_right_step=False)

    # Default call (small input -> fused-XLA fast path).
    out_fast = jax.block_until_ready(
        bound_general_step_forward(x, **params, ignore_right_step=False))
    assert out_fast.shape == x.shape and out_fast.dtype == x.dtype
    assert jnp.max(jnp.abs(out_fast - ref)) < 1e-6

    # Same input forced through the Pallas kernel (exercises the kernel on TPU).
    out_pallas = jax.block_until_ready(
        bound_general_step_forward(x, **params, ignore_right_step=False,
                                   min_pallas_elems=0))
    assert jnp.max(jnp.abs(out_pallas - ref)) < 1e-6
    assert jnp.max(jnp.abs(out_pallas - out_fast)) < 1e-6

    # ignore_right_step=True branch through the kernel.
    out_irs = jax.block_until_ready(
        bound_general_step_forward(x, **params, ignore_right_step=True,
                                   min_pallas_elems=0))
    ref_irs = _reference_forward(x, **params, ignore_right_step=True)
    assert jnp.max(jnp.abs(out_irs - ref_irs)) < 1e-6

    # Larger ragged input: exercises the multi-block grid (>=2 blocks) and the
    # <128-element tail epilogue (no whole-tensor pad).
    xb = jax.random.normal(jax.random.PRNGKey(0), (8, 8, 63, 65),
                           dtype=jnp.float32) * 3.0   # 262080 elems, 2047 rows + 64 tail
    out_b = jax.block_until_ready(
        bound_general_step_forward(xb, **params, ignore_right_step=False))
    ref_b = _reference_forward(xb, **params, ignore_right_step=False)
    assert out_b.shape == xb.shape
    assert jnp.max(jnp.abs(out_b - ref_b)) < 1e-5

    # Tiny ragged shape (< 128 elements): pure-JAX path.
    x3 = jax.random.normal(jax.random.PRNGKey(0), (3, 5, 7), dtype=jnp.float32)
    out3 = jax.block_until_ready(
        bound_general_step_forward(x3, **params, min_pallas_elems=0))
    ref3 = _reference_forward(x3, **params, ignore_right_step=False)
    assert out3.shape == x3.shape
    assert jnp.max(jnp.abs(out3 - ref3)) < 1e-6

    print("KERNEL_OK")
</pallas_src>

<mosaic_0001>
module attributes {stable_mosaic.version = 11 : i64} {
  func.func @kernel(%arg0: i32, %arg1: memref<16x128xf32, #tpu.memory_space<vmem>>, %arg2: memref<16x128xf32, #tpu.memory_space<vmem>>) attributes {dimension_semantics = [#tpu.dimension_semantics<parallel>], iteration_bounds = array<i64: 1>, scalar_prefetch = 0 : i64, scratch_operands = 0 : i64, tpu.core_type = #tpu.core_type<tc>, window_params = [{transform_indices = @transform_0, window_bounds = array<i64: 16, 128>}, {transform_indices = @transform_1, window_bounds = array<i64: 16, 128>}]} {
    %c0 = arith.constant 0 : index
    %c0_0 = arith.constant 0 : index
    %0 = vector.load %arg1[%c0, %c0_0] : memref<16x128xf32, #tpu.memory_space<vmem>>, vector<16x128xf32>
    %cst = arith.constant 1.000000e-01 : f32
    %1 = vector.broadcast %cst : f32 to vector<16x128xf32>
    %2 = arith.mulf %1, %0 : vector<16x128xf32>
    %cst_1 = arith.constant 1.000000e-01 : f32
    %3 = vector.broadcast %cst_1 : f32 to vector<16x128xf32>
    %4 = arith.addf %2, %3 : vector<16x128xf32>
    %cst_2 = arith.constant 5.000000e-01 : f32
    %5 = vector.broadcast %cst_2 : f32 to vector<16x128xf32>
    %6 = arith.mulf %5, %0 : vector<16x128xf32>
    %cst_3 = arith.constant 5.000000e-01 : f32
    %7 = vector.broadcast %cst_3 : f32 to vector<16x128xf32>
    %8 = arith.addf %6, %7 : vector<16x128xf32>
    %cst_4 = arith.constant 5.000000e-02 : f32
    %9 = vector.broadcast %cst_4 : f32 to vector<16x128xf32>
    %10 = arith.mulf %9, %0 : vector<16x128xf32>
    %cst_5 = arith.constant 0.949999988 : f32
    %11 = vector.broadcast %cst_5 : f32 to vector<16x128xf32>
    %12 = arith.addf %10, %11 : vector<16x128xf32>
    %cst_6 = arith.constant -1.000000e+00 : f32
    %13 = vector.broadcast %cst_6 : f32 to vector<16x128xf32>
    %14 = arith.cmpf olt, %0, %13 : vector<16x128xf32>
    %cst_7 = arith.constant 1.000000e+00 : f32
    %15 = vector.broadcast %cst_7 : f32 to vector<16x128xf32>
    %16 = arith.cmpf ogt, %0, %15 : vector<16x128xf32>
    %17 = arith.select %16, %12, %8 : vector<16x128xi1>, vector<16x128xf32>
    %18 = arith.select %14, %4, %17 : vector<16x128xi1>, vector<16x128xf32>
    %c0_8 = arith.constant 0 : index
    %c0_9 = arith.constant 0 : index
    %19 = vector.load %arg2[%c0_8, %c0_9] : memref<16x128xf32, #tpu.memory_space<vmem>>, vector<16x128xf32>
    tpu.vector_store %arg2[%c0_8, %c0_9], %18 {strides = array<i32>} : memref<16x128xf32, #tpu.memory_space<vmem>>, vector<16x128xf32>,
    return
  }
  func.func @transform_0(%arg0: i32) -> (i32, i32) {
    %c0_i32 = arith.constant 0 : i32
    %c0_i32_0 = arith.constant 0 : i32
    return %arg0, %c0_i32 : i32, i32
  }
  func.func @transform_1(%arg0: i32) -> (i32, i32) {
    %c0_i32 = arith.constant 0 : i32
    %c0_i32_0 = arith.constant 0 : i32
    return %arg0, %c0_i32 : i32, i32
  }
}

</mosaic_0001>

<bundles_post_ra>
// kernel: tpu_custom_call.1
= control target key start
LH: loop header
LB: loop body
LE: loop exit
PB: predicated region body
PF: predicated region fallthrough
CT: control target
= control target key end

     0   :  { %6 = vsyncpa [#allocation3], 0  ;;  %s160_s0 = inlined_call_operand.hbm [shape: f32[16,128], index: 0, kind: input, shape index: {}]   ;;  %s161_s1 = inlined_call_operand.hbm [shape: f32[16,128], index: 1, kind: output, shape index: {}]  }
   0x1   :  { %7 = vsyncpa [#allocation4], 0  ;;  %s116_s6 = smov [#allocation2]   ;;  %s68_s10 = scalar_lea.hbm %s160_s0, 256 }
   0x2   :  { %s13_s7 = sshll.u32 %s116_s6, 4  ;;  %p69_p0 = scmp.ne.s32.totalorder %s160_s0, %s68_s10  ;;  %s14_s7 = int_to_ptr.vmem [resolvable:$true] %s13_s7 }
   0x3   :  { %p72_p1 = scmp.lt.u32.totalorder %s68_s10, %s160_s0 }
   0x5   :  { %p74_p2 = pnand %p72_p1, %p69_p0 }
   0x7   :  { %77 = shalt.err (!%p74_p2)
}
   0x8   :  { %s78_s15 = scalar_lea.vmem %s14_s7, 256  ;;  %p83_p4 = scmp.lt.s32.totalorder %s14_s7, %s14_s7 }
   0x9   :  { %p79_p3 = scmp.ne.s32.totalorder %s14_s7, %s78_s15  ;;  %p84_p5 = scmp.lt.s32.totalorder %s78_s15, %s78_s15 }
   0xb   :  { %p85_p6 = por %p84_p5, %p83_p4 }
   0xd   :  { %p86_p7 = pnand %p85_p6, %p79_p3 }
   0xf   :  { %89 = shalt.err (!%p86_p7)
}
  0x10   :  { %s117_s16 = smov 128   ;;  %s118_s17 = smov 8  }
  0x11   :  { %19 = dma.hbm_to_vmem [thread:$0]  %s160_s0, 256, %s14_s7, [#allocation3], %s117_s16, %s117_s16, %s118_s17  }
  0x12   :  { %112 = dma.done.wait [#allocation3], 256  }
  0x13   :  { %113 = vsyncadd [#allocation3], 4294967040  ;;  %v23_v0 = vld [vmem:[#allocation2] sm:$0xff]  ;;  %v24_v1 = vld [vmem:[#allocation2 + $0x8] sm:$0xff]  ;;  %s119_s20 = smov [#allocation5]  }
  0x14   :  { %s52_s21 = sshll.u32 %s119_s20, 4  ;;  %v25_v2 = vmul.f32 0.1, %v23_v0  ;;  %v29_v3 = vmul.f32 0.5, %v23_v0  ;;  %v33_v4 = vmul.f32 0.05, %v23_v0  ;;  %s53_s21 = int_to_ptr.vmem [resolvable:$true] %s52_s21 }
  0x15   :  { %vm37_vm0 = vcmp.lt.f32.partialorder %v23_v0, -1.0  ;;  %vm39_vm1 = vcmp.gt.f32.partialorder %v23_v0, 1.0  ;;  %v26_v5 = vmul.f32 0.1, %v24_v1  ;;  %v30_v6 = vmul.f32 0.5, %v24_v1  ;;  %s90_s0 = scalar_lea.vmem %s53_s21, 256  ;;  %p95_p9 = scmp.lt.s32.totalorder %s53_s21, %s53_s21 }
  0x16   :  { %v34_v7 = vmul.f32 0.05, %v24_v1  ;;  %v27_v8 = vadd.f32 0.1, %v25_v2  ;;  %v31_v9 = vadd.f32 0.5, %v29_v3  ;;  %vm38_vm2 = vcmp.lt.f32.partialorder %v24_v1, -1.0  ;;  %p91_p8 = scmp.ne.s32.totalorder %s53_s21, %s90_s0  ;;  %p96_p10 = scmp.lt.s32.totalorder %s90_s0, %s90_s0 }
  0x17   :  { %v35_v10 = vadd.f32 0.95, %v33_v4  ;;  %v28_v11 = vadd.f32 0.1, %v26_v5  ;;  %v32_v12 = vadd.f32 0.5, %v30_v6  ;;  %vm40_vm3 = vcmp.gt.f32.partialorder %v24_v1, 1.0 }
  0x18   :  { %v36_v13 = vadd.f32 0.95, %v34_v7  ;;  %p97_p11 = por %p96_p10, %p95_p9 }
  0x19   :  { %v41_v14 = vsel %vm39_vm1, %v35_v10, %v31_v9 }
  0x1a   :  { %v43_v15 = vsel %vm37_vm0, %v27_v8, %v41_v14  ;;  %v42_v16 = vsel %vm40_vm3, %v36_v13, %v32_v12  ;;  %p98_p12 = pnand %p97_p11, %p91_p8 }
  0x1b   :  { %45 = vst [vmem:[#allocation5] sm:$0xff] %v43_v15  ;;  %v44_v17 = vsel %vm38_vm2, %v28_v11, %v42_v16 }
  0x1c   :  { %46 = vst [vmem:[#allocation5 + $0x8] sm:$0xff] %v44_v17 }
  0x1d   :  { %101 = shalt.err (!%p98_p12)
}
  0x1e   :  { %s102_s24 = scalar_lea.hbm %s161_s1, 256 }
  0x1f   :  { %p103_p13 = scmp.ne.s32.totalorder %s161_s1, %s102_s24  ;;  %p106_p0 = scmp.lt.u32.totalorder %s102_s24, %s161_s1 }
  0x21   :  { %p108_p1 = pnand %p106_p0, %p103_p13 }
  0x23   :  { %111 = shalt.err (!%p108_p1)
}
  0x24   :  { %58 = dma.vmem_to_hbm [thread:$0]  %s53_s21, 256, %s161_s1, [#allocation4], %s117_s16, %s117_s16, %s118_s17  }
  0x25   :  { %114 = dma.done.wait [#allocation4], 256  }
  0x26   :  { %115 = vsyncadd [#allocation4], 4294967040 }
  0x27   :  { %62 = vsyncpa [#allocation3], 1 }
  0x28   :  { %63 = vsyncpa [#allocation4], 1 }

</bundles_post_ra>
